<compile_context>
chip_gen: v7x
topology: tpu7x:2x2x1
jax: 0.10.0
libtpu: 0.0.40
codegen_flags: <defaults>
</compile_context>

<pallas_src>
import jax
import jax.numpy as jnp
from jax.experimental import pallas as pl
from jax.experimental.pallas import tpu as pltpu


def _round_down(v, m):
    return (v // m) * m


def _sublane_multiple(dtype) -> int:
    # f32 -> 8, bf16 -> 16, int8/fp8 -> 32 (sub-32-bit dtypes pack along sublanes).
    return max(8, 32 // jnp.dtype(dtype).itemsize)


def _vmem_capacity_bytes():
    try:
        info = pltpu.get_tpu_info()
    except Exception:
        return None
    for name in ("vmem_capacity_bytes", "vmem_size_bytes", "vmem_bytes"):
        v = getattr(info, name, None)
        if isinstance(v, int) and v > 0:
            return v
    return None


def _block_budget():
    """Returns (target_block_bytes, vmem_limit_bytes) tuned per TPU generation."""
    vmem = _vmem_capacity_bytes()
    if vmem is None or vmem <= 64 * 1024 * 1024:
        # v7x (64 MiB / TC) or unknown chip: 4 double-buffered 4 MiB blocks =
        # 16 MiB live, comfortably under a 48 MiB scoped limit.
        return 4 * 1024 * 1024, 48 * 1024 * 1024
    # v5e / v6e (128 MiB physical): bigger blocks amortize the ~0.35 us/step cost.
    return 6 * 1024 * 1024, 64 * 1024 * 1024


def _drop_path_kernel_3d(mask_ref, x_ref, o_ref):
    # mask_ref: (B,) f32 in SMEM; x_ref/o_ref: (1, TM, L) VMEM tile of sample b.
    b = pl.program_id(0)
    scale = mask_ref[b].astype(x_ref.dtype)   # native-dtype multiply (bf16 VALU on v6e/v7x)
    o_ref[...] = (x_ref[...] * scale).astype(o_ref.dtype)


def _drop_path_kernel_2d(x_ref, mask_ref, o_ref):
    # x_ref/o_ref: (TB, TN) tile; mask_ref: (TB, 1) per-sample scale in x.dtype.
    o_ref[...] = (x_ref[...] * mask_ref[...]).astype(o_ref.dtype)


def drop_path(x, key, drop_prob: float = 0.0, training: bool = False,
              scale_by_keep: bool = True):
    """Pallas implementation of per-sample stochastic depth (DropPath forward)."""
    if drop_prob == 0.0 or not training:
        return x

    keep_prob = 1.0 - drop_prob
    orig_shape = x.shape
    B = orig_shape[0]
    N = 1
    for d in orig_shape[1:]:
        N *= d

    # Per-sample Bernoulli keep mask, computed in f32.
    # TODO(synk): could be drawn in-kernel via pltpu.prng_random_bits, at the
    # cost of not matching jax.random.bernoulli bit-for-bit.
    keep = jax.random.bernoulli(key, p=keep_prob, shape=(B,)).astype(jnp.float32)
    if keep_prob > 0.0 and scale_by_keep:
        mask = keep / jnp.float32(keep_prob)
    else:
        mask = keep

    itemsize = jnp.dtype(x.dtype).itemsize
    target_block_bytes, vmem_limit = _block_budget()
    max_block_elems = max(1024, target_block_bytes // itemsize)
    sublane = _sublane_multiple(x.dtype)

    # --- Small-batch path: (B, tile) blocks would waste sublanes, so reshape
    # each sample to (M, L) with L lane-dense and tile as (1, TM, L). ---------
    use_3d = B < 8
    L = 0
    if use_3d:
        for cand in (2048, 1024, 512, 256, 128):     # prefer the widest divisor
            if N % cand == 0:
                L = cand
                break
        use_3d = L > 0

    if use_3d:
        M = N // L
        if M <= sublane:
            TM = M                                   # full dim -> always legal
        else:
            TM = min(M, max(sublane,
                            _round_down(max_block_elems // L, sublane)))
        x3 = x.reshape(B, M, L)
        out = pl.pallas_call(
            _drop_path_kernel_3d,
            out_shape=jax.ShapeDtypeStruct((B, M, L), x.dtype),
            grid=(B, pl.cdiv(M, TM)),
            in_specs=[
                pl.BlockSpec(memory_space=pltpu.MemorySpace.SMEM),   # (B,) f32 mask
                pl.BlockSpec((1, TM, L), lambda b, j: (b, j, 0)),
            ],
            out_specs=pl.BlockSpec((1, TM, L), lambda b, j: (b, j, 0)),
            input_output_aliases={1: 0},             # x3 may donate its HBM buffer
            compiler_params=pltpu.CompilerParams(
                dimension_semantics=("parallel", "parallel"),
                vmem_limit_bytes=vmem_limit),
        )(mask, x3)
        return out.reshape(orig_shape)

    # --- General path: (B, N), tiled over batch (sublane-multiple TB) and
    # lanes (128-multiple tile_n); partial tail blocks handled by Pallas. -----
    x2 = x.reshape(B, N)
    mask2 = mask.astype(x.dtype).reshape(B, 1)

    if N <= 128:
        tile_n = N                                   # full dim -> always legal
    else:
        tile_n = min(_round_down(N, 128),
                     max(128, _round_down(max_block_elems // sublane, 128)))
    tb_budget = max(1, max_block_elems // tile_n)
    if B <= tb_budget:
        TB = B                                       # full dim -> always legal
    else:
        TB = max(sublane, _round_down(tb_budget, sublane))

    out = pl.pallas_call(
        _drop_path_kernel_2d,
        out_shape=jax.ShapeDtypeStruct((B, N), x.dtype),
        grid=(pl.cdiv(B, TB), pl.cdiv(N, tile_n)),
        in_specs=[
            pl.BlockSpec((TB, tile_n), lambda i, j: (i, j)),
            pl.BlockSpec((TB, 1), lambda i, j: (i, 0)),   # per-sample scale
        ],
        out_specs=pl.BlockSpec((TB, tile_n), lambda i, j: (i, j)),
        input_output_aliases={0: 0},                 # x2 may donate its HBM buffer
        compiler_params=pltpu.CompilerParams(
            dimension_semantics=("parallel", "parallel"),
            vmem_limit_bytes=vmem_limit),
    )(x2, mask2)
    return out.reshape(orig_shape)


class DropPath:
    """Mirrors the PyTorch DropPath module (no learnable parameters)."""

    def __init__(self, drop_prob: float = 0.0, scale_by_keep: bool = True):
        self.drop_prob = float(drop_prob)
        self.scale_by_keep = scale_by_keep
        self.training = True

    def __call__(self, x, key):
        return drop_path(x, key, self.drop_prob, self.training, self.scale_by_keep)


if __name__ == "__main__":
    key = jax.random.PRNGKey(0)
    kx, km, kx2, km2, kx3, km3 = jax.random.split(key, 6)
    keep_prob = 0.75

    # Small NCHW input (3-D path: B=2 < 8, N = 4*16*16 = 1024).
    x = jax.random.normal(kx, (2, 4, 16, 16), dtype=jnp.float32)

    # Eval / drop_prob==0 path: identity (no kernel launch, same as PyTorch).
    mod_eval = DropPath(drop_prob=0.25)
    mod_eval.training = False
    y_eval = mod_eval(x, km)
    assert jnp.allclose(y_eval, x)

    # Training path: per-sample mask applied by the Pallas kernel (3-D path).
    mod = DropPath(drop_prob=0.25, scale_by_keep=True)
    y = jax.block_until_ready(mod(x, km))
    for b in range(x.shape[0]):
        dropped = bool(jnp.allclose(y[b], 0.0))
        kept = bool(jnp.allclose(y[b], x[b] / keep_prob, atol=1e-6))
        assert dropped or kept, "DropPath 3D-path output mismatch"

    # 2-D path: batch >= 8, N = 3*5*7 = 105 (not a multiple of 128).
    x2 = jax.random.normal(kx2, (8, 3, 5, 7), dtype=jnp.float32)
    y2 = jax.block_until_ready(mod(x2, km2))
    for b in range(x2.shape[0]):
        dropped = bool(jnp.allclose(y2[b], 0.0))
        kept = bool(jnp.allclose(y2[b], x2[b] / keep_prob, atol=1e-6))
        assert dropped or kept, "DropPath 2D-path output mismatch"

    # bf16 2-D path: native-dtype multiply, B=16 (sublane multiple for bf16).
    x3 = jax.random.normal(kx3, (16, 4, 16, 16), dtype=jnp.bfloat16)
    y3 = jax.block_until_ready(mod(x3, km3))
    keep3 = jax.random.bernoulli(km3, p=keep_prob, shape=(16,)).astype(jnp.float32)
    scale3 = (keep3 / jnp.float32(keep_prob)).astype(jnp.bfloat16)
    ref3 = x3 * scale3.reshape(16, 1, 1, 1)
    assert jnp.allclose(y3.astype(jnp.float32), ref3.astype(jnp.float32),
                        rtol=2e-2, atol=1e-6), "DropPath bf16-path output mismatch"

    print("KERNEL_OK")
</pallas_src>

<mosaic_0001>
module attributes {stable_mosaic.version = 11 : i64} {
  func.func @_drop_path_kernel_3d(%arg0: i32, %arg1: i32, %arg2: memref<2xf32, #tpu.memory_space<smem>>, %arg3: memref<1x1x1024xf32, #tpu.memory_space<vmem>>, %arg4: memref<1x1x1024xf32, #tpu.memory_space<vmem>>) attributes {dimension_semantics = [#tpu.dimension_semantics<parallel>, #tpu.dimension_semantics<parallel>], iteration_bounds = array<i64: 2, 1>, scalar_prefetch = 0 : i64, scratch_operands = 0 : i64, tpu.core_type = #tpu.core_type<tc>, window_params = [{transform_indices = @transform_0, window_bounds = array<i64: 2>}, {transform_indices = @transform_1, window_bounds = array<i64: 1, 1, 1024>}, {transform_indices = @transform_2, window_bounds = array<i64: 1, 1, 1024>}]} {
    %0 = arith.index_cast %arg0 : i32 to index
    %1 = memref.load %arg2[%0] : memref<2xf32, #tpu.memory_space<smem>>
    %c0 = arith.constant 0 : index
    %c0_0 = arith.constant 0 : index
    %c0_1 = arith.constant 0 : index
    %2 = vector.load %arg3[%c0, %c0_0, %c0_1] : memref<1x1x1024xf32, #tpu.memory_space<vmem>>, vector<1x1x1024xf32>
    %3 = vector.broadcast %1 : f32 to vector<1x1x1024xf32>
    %4 = arith.mulf %2, %3 : vector<1x1x1024xf32>
    %c0_2 = arith.constant 0 : index
    %c0_3 = arith.constant 0 : index
    %c0_4 = arith.constant 0 : index
    %5 = vector.load %arg4[%c0_2, %c0_3, %c0_4] : memref<1x1x1024xf32, #tpu.memory_space<vmem>>, vector<1x1x1024xf32>
    tpu.vector_store %arg4[%c0_2, %c0_3, %c0_4], %4 {strides = array<i32>} : memref<1x1x1024xf32, #tpu.memory_space<vmem>>, vector<1x1x1024xf32>,
    return
  }
  func.func @transform_0(%arg0: i32, %arg1: i32) -> i32 {
    %c0_i32 = arith.constant 0 : i32
    %c0_i32_0 = arith.constant 0 : i32
    return %c0_i32 : i32
  }
  func.func @transform_1(%arg0: i32, %arg1: i32) -> (i32, i32, i32) {
    %c0_i32 = arith.constant 0 : i32
    %c0_i32_0 = arith.constant 0 : i32
    return %arg0, %arg1, %c0_i32 : i32, i32, i32
  }
  func.func @transform_2(%arg0: i32, %arg1: i32) -> (i32, i32, i32) {
    %c0_i32 = arith.constant 0 : i32
    %c0_i32_0 = arith.constant 0 : i32
    return %arg0, %arg1, %c0_i32 : i32, i32, i32
  }
}

</mosaic_0001>

<bundles_post_ra>
// kernel: tpu_custom_call.1
= control target key start
LH: loop header
LB: loop body
LE: loop exit
PB: predicated region body
PF: predicated region fallthrough
CT: control target
= control target key end

     0   :  { %7 = vsyncpa [#allocation5], 0  ;;  %s753_s0 = inlined_call_operand.vmem [shape: f32[2], index: 0, kind: input, shape index: {}]   ;;  %s754_s1 = inlined_call_operand.hbm [shape: f32[2,1,1024], index: 1, kind: input, shape index: {}, may-alias: {1,2}]   ;;  %s755_s2 = inlined_call_operand.hbm [shape: f32[2,1,1024], index: 2, kind: output, shape index: {}, may-alias: {1,2}]  }
   0x1   :  { %8 = vsyncpa [#allocation3], 0 }
   0x2   :  { %10 = vsyncpa [#allocation3 + $0x1], 0 }
   0x3   :  { %11 = vsyncpa [#allocation4], 0 }
   0x4   :  { %13 = vsyncpa [#allocation4 + $0x1], 0  ;;  %s553_s9 = smov 0   ;;  %s555_s10 = smov 0  }
   0x5   :  { %s557_s11 = smov 0   ;;  %s559_s12 = smov 0  }
   0x6   :  { %s561_s13 = smov 0   ;;  %s563_s14 = smov 0  }
   0x7 LB: > { %s310_s15 = sadd.s32 4294967295, %s533_s14   ;;  %s311_s16 = sadd.s32 4294967294, %s533_s14   ;;  %s533_s14 = sphi %s563_s14, %s19_s14   ;;  %s529_s13 = sphi %s561_s13, %s777_s13   ;;  %s525_s12 = sphi %s559_s12, %s776_s12   ;;  %s521_s11 = sphi %s557_s11, %s775_s11   ;;  %s517_s10 = sphi %s555_s10, %s774_s10   ;;  %s513_s9 = sphi %s553_s9, %s773_s9  }
   0x8   : > { %p74_p0 = scmp.ne.s32.totalorder %s517_s10, %s513_s9  ;;  %p587_p1 = scmp.eq.s32.totalorder %s310_s15, 0 }
   0x9   : > { %p591_p2 = scmp.eq.s32.totalorder %s310_s15, 1  ;;  %p106_p3 = scmp.eq.s32.totalorder %s311_s16, 1 }
   0xa   : > { %s760_s17 = scalar_select %p587_p1, 1, 0 }
   0xb   : > { %p597_p4 = por %p587_p1, %p74_p0  ;;  %p312_p5 = scmp.ge.s32.totalorder %s533_s14, 1 }
   0xc   : > { %p602_p6 = por %p106_p3, %p74_p0  ;;  %p113_p7 = scmp.lt.s32.totalorder %s533_s14, 3 }
   0xd   : > { %s762_s19 = scalar_select %p597_p4, 1, 0 }
   0xe   : > { %s763_s20 = scalar_select %p602_p6, 1, 0 }
   0xf   : > { %s126_s23 = sshll.u32 %s753_s0, 4  ;;  %p610_p8 = pnand %p312_p5, %p113_p7  ;;  %s127_s23 = int_to_ptr.vmem [resolvable:$true] %s126_s23 }
  0x10   : > { %s31_s26 = sadd.s32 1, %s529_s13  ;;  %s61_s27 = sadd.s32 1, %s521_s11 }
  0x11   : > { %p337_p10 = pneg %p610_p8  ;;  %p33_p12 = scmp.ge.s32.totalorder %s31_s26, 2 }
  0x12   : > { %s402_s28 = scalar_lea.vmem %s127_s23, 16  ;;  %p410_p7 = scmp.lt.s32.totalorder %s127_s23, %s127_s23 }
  0x13   : > { %p619_p11 = pnand %p337_p10, %p587_p1  ;;  %p403_p13 = scmp.ne.s32.totalorder %s127_s23, %s402_s28 }
  0x14   : > { %p411_p6 = scmp.lt.s32.totalorder %s402_s28, %s402_s28 }
  0x15   : > { %p404_p0 = pneg %p619_p11 }
  0x16   : > { %p412_p9 = por %p411_p6, %p410_p7 }
  0x17   : > { %p405_p3 = pnand %p404_p0, %p403_p13 }
  0x19   : > { %p406_p5 = pneg %p405_p3 }
  0x1b   : > { %p413_p4 = pnand %p412_p9, %p406_p5 }
  0x1d   : > { %416 = shalt.err (!%p413_p4)
}
  0x1e   : > { %s535_s29 = smov [#allocation2]   ;;  %s779_s26 = smov (%p33_p12, %s31_s26), 0 }
  0x1f   : > { %340 = dma.vmem_to_smem (!%p619_p11), %s127_s23, 16, %s535_s29, [#allocation5]  }
  0x20   : > { %p68_p10 = scmp.ne.s32.totalorder %s521_s11, %s517_s10  ;;  %p69_p6 = scmp.eq.s32.totalorder %s533_s14, 0 }
  0x21   : > { %s56_s30 = ssub.s32 %s529_s13, %s779_s26  ;;  %p350_p4 = scmp.lt.s32.totalorder %s533_s14, 2 }
  0x22   : > { %p59_p9 = scmp.eq.s32.totalorder %s56_s30, 0  ;;  %p70_p13 = por %p69_p6, %p68_p10 }
  0x23   : > { %p639_p0 = por %p591_p2, %p68_p10  ;;  %s137_s4 = sand.u32 1, %s521_s11  }
  0x24   : > { %s645_s5 = scalar_select %p59_p9, %s521_s11, %s61_s27  }
  0x25   : > { %s766_s3 = scalar_select %p639_p0, 1, 0 }
  0x26   : > { %s315_s6 = sshll.u32 %s137_s4, 3  ;;  %s327_s7 = sshll.u32 %s529_s13, 7 }
  0x27   : > { %s651_s16 = scalar_lea.hbm %s754_s1, %s327_s7  ;;  %s141_s21 = scalar_lea.vmem [#allocation6], %s315_s6 }
  0x28   : > { %s151_s18 = sshll.u32 %s141_s21, 4  ;;  %p655_p2 = pnand %p350_p4, %p70_p13  ;;  %s653_s18 = int_to_ptr.vmem [resolvable:$true] %s151_s18 }
  0x29   : > { %s138_s23 = scalar_lea.sflag [#allocation3], %s137_s4  ;;  %s417_s25 = scalar_lea.hbm %s651_s16, 128 }
  0x2a   : > { %p418_p11 = scmp.ne.s32.totalorder %s651_s16, %s417_s25  ;;  %p419_p12 = pneg %p655_p2 }
  0x2b   : > { %s422_s29 = scalar_lea.hbm %s754_s1, 256  ;;  %p423_p7 = scmp.lt.u32.totalorder %s651_s16, %s754_s1 }
  0x2c   : > { %p420_p3 = pnand %p419_p12, %p418_p11  ;;  %p424_p10 = scmp.lt.u32.totalorder %s422_s29, %s417_s25 }
  0x2d   : > { %p426_p4 = scmp.lt.u32.totalorder %s417_s25, %s651_s16 }
  0x2e   : > { %p421_p5 = pneg %p420_p3  ;;  %p425_p6 = por %p424_p10, %p423_p7 }
  0x30   : > { %p427_p9 = por %p426_p4, %p425_p6 }
  0x32   : > { %p428_p13 = pnand %p427_p9, %p421_p5 }
  0x34   : > { %431 = shalt.err (!%p428_p13)
}
  0x35   : > { %s432_s4 = scalar_lea.vmem %s653_s18, 128  ;;  %s536_s7 = smov [#allocation6]  }
  0x36   : > { %p433_p11 = scmp.ne.s32.totalorder %s653_s18, %s432_s4  ;;  %s437_s8 = sshll.u32 %s536_s7, 4  ;;  %s438_s8 = int_to_ptr.vmem [resolvable:$false] %s437_s8 }
  0x37   : > { %s439_s15 = scalar_lea.vmem %s438_s8, 256  ;;  %p440_p1 = scmp.lt.s32.totalorder %s653_s18, %s438_s8 }
  0x38   : > { %p435_p3 = pnand %p433_p11, %p419_p12  ;;  %p441_p7 = scmp.lt.s32.totalorder %s439_s15, %s432_s4 }
  0x3a   : > { %p436_p0 = pneg %p435_p3  ;;  %p442_p10 = por %p441_p7, %p440_p1 }
  0x3c   : > { %p443_p6 = pnand %p442_p10, %p436_p0 }
  0x3e   : > { %446 = shalt.err (!%p443_p6)
}
  0x3f   : > { %344 = dma.hbm_to_vmem [thread:$0]  (!%p655_p2), %s651_s16, 128, %s653_s18, %s138_s23  }
  0x40   : > { %160 = sbr.rel (%p610_p8) target bundleno = 104 (0x68), region = 28  ;;  %p768_p12 = scmp.ne.s32.totalorder (!%p610_p8), %s760_s17, 0 }
  0x47   : > { %500 = dma.done.wait (%p768_p12), [#allocation5], 16  }
  0x48   : > { %502 = vsyncadd (%p768_p12), [#allocation5], 4294967280  ;;  %s691_s21 = sand.u32 1, %s517_s10   ;;  %p769_p1 = scmp.ne.s32.totalorder %s762_s19, 0 }
  0x49   : > { %s320_s25 = sshll.u32 %s691_s21, 3  ;;  %s167_s22 = scalar_lea.sflag [#allocation3], %s691_s21 }
  0x4a   : > { %s170_s27 = scalar_lea.vmem [#allocation6], %s320_s25 }
  0x4b   : > { %504 = dma.done.wait (%p769_p1), %s167_s22, 128  }
  0x4c   : > { %506 = vsyncadd (%p769_p1), %s167_s22, 4294967168 }
  0x4d   : > { %175 = sfence }
  0x4e   : > { %s192_s17 = sld [smem:[#allocation2 + %s525_s12]]  ;;  %v193_v0 = vld [vmem:[%s170_s27] sm:$0xff]  ;;  %s191_s24 = scalar_lea.vmem [#allocation7], %s320_s25 }
  0x4f   : > { %s214_s16 = sshll.u32 %s191_s24, 4  ;;  %s328_s18 = sshll.u32 %s525_s12, 7  ;;  %s701_s16 = int_to_ptr.vmem [resolvable:$true] %s214_s16 }
  0x50   : > { %s706_s19 = scalar_lea.hbm %s755_s2, %s328_s18  ;;  %s198_s29 = scalar_lea.sflag [#allocation4], %s691_s21 }
  0x51   : > { %s447_s30 = scalar_lea.vmem %s701_s16, 128  ;;  %p770_p0 = scmp.ne.s32.totalorder %s766_s3, 0 }
  0x52   : > { %p448_p8 = scmp.ne.s32.totalorder %s701_s16, %s447_s30  ;;  %s537_s12 = smov [#allocation7]  }
  0x53   : > { %s451_s6 = sshll.u32 %s537_s12, 4  ;;  %s452_s6 = int_to_ptr.vmem [resolvable:$false] %s451_s6 }
  0x54   : > { %v194_v1 = vstv %s192_s17  ;;  %p449_p2 = pnand %p448_p8, %p770_p0  ;;  %s453_s4 = scalar_lea.vmem %s452_s6, 256 }
  0x55   : > { %v195_v2 = vmul.f32 %v194_v1, %v193_v0  ;;  %p454_p4 = scmp.lt.s32.totalorder %s701_s16, %s452_s6  ;;  %p455_p9 = scmp.lt.s32.totalorder %s453_s4, %s447_s30 }
  0x56   : > { %p450_p5 = pneg %p449_p2 }
  0x57   : > { %196 = vst [vmem:[%s191_s24] sm:$0xff] %v195_v2  ;;  %p456_p13 = por %p455_p9, %p454_p4 }
  0x59   : > { %p457_p11 = pnand %p456_p13, %p450_p5 }
  0x5b   : > { %460 = shalt.err (!%p457_p11)
}
  0x5c   : > { %s461_s7 = scalar_lea.hbm %s706_s19, 128  ;;  %s465_s21 = scalar_lea.hbm %s755_s2, 256 }
  0x5d   : > { %p462_p3 = scmp.ne.s32.totalorder %s706_s19, %s461_s7  ;;  %p466_p6 = scmp.lt.u32.totalorder %s706_s19, %s755_s2 }
  0x5e   : > { %p467_p12 = scmp.lt.u32.totalorder %s465_s21, %s461_s7  ;;  %p469_p8 = scmp.lt.u32.totalorder %s461_s7, %s706_s19 }
  0x5f   : > { %p463_p7 = pnand %p462_p3, %p770_p0 }
  0x60   : > { %p468_p1 = por %p467_p12, %p466_p6 }
  0x61   : > { %p464_p10 = pneg %p463_p7 }
  0x62   : > { %p470_p2 = por %p469_p8, %p468_p1 }
  0x64   : > { %p471_p5 = pnand %p470_p2, %p464_p10 }
  0x66   : > { %474 = shalt.err (!%p471_p5)
}
  0x67   : > { %335 = dma.vmem_to_hbm [thread:$0]  (%p770_p0), %s701_s16, 128, %s706_s19, %s198_s29  }
  0x68 PF: > { %s226_s27 = sand.u32 1, %s513_s9   ;;  %p771_p4 = scmp.ne.s32.totalorder %s763_s20, 0 }
  0x69   : > { %p772_p9 = scmp.ge.s32.totalorder %s533_s14, 2  ;;  %s227_s17 = scalar_lea.sflag [#allocation4], %s226_s27 }
  0x6b   : > { %p346_p13 = pnand %p772_p9, %p771_p4 }
  0x6d   : > { %508 = dma.done.wait (!%p346_p13), %s227_s17, 128  }
  0x6e   : > { %510 = vsyncadd (!%p346_p13), %s227_s17, 4294967168  ;;  %s19_s14 = sadd.s32 1, %s533_s14   ;;  %s773_s9 = smov %s517_s10 }
  0x6f   : > { %p16_p11 = scmp.ge.s32.totalorder %s19_s14, 4   ;;  %s774_s10 = smov %s521_s11 }
  0x70   : > { %s775_s11 = smov %s645_s5  ;;  %s776_s12 = smov %s529_s13 }
  0x71   : > { %s777_s13 = smov %s779_s26  ;;  %18 = sbr.rel (!%p16_p11) target bundleno = 7 (0x7), region = 78 }
  0x78   :  { %232 = vsyncpa [#allocation3], 1 }
  0x79   :  { %234 = vsyncpa [#allocation3 + $0x1], 1 }
  0x7a   :  { %235 = vsyncpa [#allocation4], 1 }
  0x7b   :  { %237 = vsyncpa [#allocation4 + $0x1], 1 }
  0x7c   :  { %238 = vsyncpa [#allocation5], 1 }
  0x7d   :  { %240 = vsyncpa [#allocation5 + $0x1], 1 }

</bundles_post_ra>
